<compile_context>
chip_gen: v7x
topology: tpu7x:2x2x1
jax: 0.10.0
libtpu: 0.0.40
codegen_flags: <defaults>
</compile_context>

<pallas_src>
from functools import partial

import jax
import jax.numpy as jnp
from jax.experimental import pallas as pl
from jax.experimental.pallas import tpu as pltpu


def _round_up(x, m):
    return ((x + m - 1) // m) * m


def _choose_row_tile(M, pref):
    """Largest multiple of 8 <= pref whose M-padding overhead stays small."""
    M8 = _round_up(max(M, 1), 8)
    pref = max(8, min(pref, M8))
    best = 8
    t = 8
    while t <= pref:
        pad = _round_up(M, t) - M
        if pad <= max(M // 8, 7):      # <=12.5% wasted rows (always ok for tiny M)
            best = t
        t += 8
    return best


def _choose_hidden_tile(H, pref):
    """Pick (tile, H_pad): tile is a multiple of 128 <= pref and H_pad is a
    multiple of tile >= H.  Prefers zero extra padding, but allows <=12.5%
    padding beyond the mandatory 128-lane round-up in exchange for a bigger
    tile (avoids silently collapsing to 128-wide tiles on awkward H)."""
    H128 = _round_up(H, 128)
    pref = max(128, min((pref // 128) * 128, H128))
    best_t = 128
    t = 128
    while t <= pref:
        extra = _round_up(H128, t) - H128
        if extra <= H128 // 8:
            best_t = t                 # largest qualifying tile wins
        t += 128
    return best_t, _round_up(H128, best_t)


def _default_config():
    """Per-generation tile preferences keyed off VMEM capacity."""
    vmem_cap = 128 << 20
    try:
        info = pltpu.get_tpu_info()
        vmem_cap = int(getattr(info, "vmem_capacity_bytes", vmem_cap))
    except Exception:
        pass
    if vmem_cap <= (64 << 20):
        # v7x-class: 64 MiB VMEM/TC, ~3.2 TB/s HBM -> modest tiles already
        # compute-bound; keep VMEM headroom.
        return dict(tm=512, th=1024, vmem_limit=48 << 20)
    # v5e / v6e: 128 MiB VMEM.  1K output tiles (~512 flop/byte) cover the
    # worst-case (v6e) compute:HBM ratio region; also fine (overkill) on v5e.
    return dict(tm=1024, th=1024, vmem_limit=64 << 20)


def _linear_residual_kernel(scale_ref, x_ref, w_ref, b_ref, out_ref,
                            acc_ref, res_ref, *, weighting_type):
    # scale_ref: SMEM (1,) f32 scalar
    # x_ref:   (tm, tk)   matmul LHS tile (native dtype)
    # w_ref:   (tk, tn)   pre-transposed weight tile W^T (native dtype)
    # b_ref:   (1,  tn)   f32 bias tile (already scale-folded for 'residual')
    # out_ref: (tm, tn)   output tile
    # acc_ref: (tm, tn)   f32 VMEM accumulator scratch
    # res_ref: (tm, tn)   VMEM stash of the residual (x) tile, native dtype
    j = pl.program_id(1)
    k = pl.program_id(2)

    @pl.when(k == 0)
    def _init():
        acc_ref[...] = jnp.zeros_like(acc_ref)

    # With tn == tk, the x matmul tile at k == j is exactly the (i, j) residual
    # tile: stash it instead of streaming x from HBM a second time.
    @pl.when(k == j)
    def _stash_residual():
        res_ref[...] = x_ref[...]

    # Hot loop: MXU only.  Operands stay in their native dtype; f32 accumulate.
    acc_ref[...] += jnp.dot(x_ref[...], w_ref[...],
                            preferred_element_type=jnp.float32)

    @pl.when(k == pl.num_programs(2) - 1)
    def _epilogue():
        s = scale_ref[0]                              # one SMEM scalar read
        r = res_ref[...].astype(jnp.float32)
        bias = b_ref[...]                             # f32 (1, tn), broadcasts
        if weighting_type == 'residual':
            # scale*(xW^T) + (x + scale*b)   (bias pre-scaled in wrapper)
            out = s * acc_ref[...] + (r + bias)
        else:                                         # 'shortcut'
            # (xW^T + b) + scale*x
            out = acc_ref[...] + (s * r + bias)
        out_ref[...] = out.astype(out_ref.dtype)      # single final cast/store


def linear_residual(x, w, b, scale, *, weighting_type='residual',
                    tm_pref=None, th_pref=None, vmem_limit_bytes=None):
    """x: [batch, seq, hidden]; w: [hidden, hidden] (PyTorch [out, in]);
    b: [hidden]; scale: python/array scalar."""
    assert weighting_type in ('residual', 'shortcut'), weighting_type
    B, S, H = x.shape
    H_out, H_in = w.shape
    assert H_in == H and b.shape == (H_out,)
    assert H_out == H, "residual add requires layer(x) to match x's hidden dim"

    cfg = _default_config()
    tm_pref = cfg['tm'] if tm_pref is None else tm_pref
    th_pref = cfg['th'] if th_pref is None else th_pref
    vmem_limit_bytes = cfg['vmem_limit'] if vmem_limit_bytes is None else vmem_limit_bytes

    M = B * S
    x2 = x.reshape(M, H)

    # TODO(synk): the weight transpose (+pad) is an H^2 read/write every call;
    # in a real model, pre-transpose / pre-pad the parameter once and pass it in.
    wT = w.T                                    # [H_in, H_out]

    # Tiled geometry: lane-dense hidden tile shared by N and K (tn == tk is
    # required for the residual-reuse trick), sublane-aligned row tile.
    th, H_pad = _choose_hidden_tile(H, th_pref)
    tn = tk = th
    tm = _choose_row_tile(M, tm_pref)
    M_pad = _round_up(M, tm)
    assert tn == tk and H_pad % tn == 0 and M_pad % tm == 0

    # Skip wrapper-side pads when shapes are already aligned (each pad is an
    # extra full HBM read+write of the array).
    x_p = x2 if (M_pad == M and H_pad == H) else jnp.pad(
        x2, ((0, M_pad - M), (0, H_pad - H)))
    w_p = wT if H_pad == H else jnp.pad(
        wT, ((0, H_pad - H), (0, H_pad - H)))

    scale_f32 = jnp.asarray(scale, jnp.float32)
    # Fold the scale into the bias for the 'residual' path -> leaner epilogue.
    b_eff = (scale_f32 * b.astype(jnp.float32) if weighting_type == 'residual'
             else b.astype(jnp.float32)).reshape(1, H)
    if H_pad != H:
        b_eff = jnp.pad(b_eff, ((0, 0), (0, H_pad - H)))
    scale_arr = scale_f32.reshape(1)

    m_steps, n_steps, k_steps = M_pad // tm, H_pad // tn, H_pad // tk
    grid = (m_steps, n_steps, k_steps)

    itemsize = x.dtype.itemsize
    cost = pl.CostEstimate(
        flops=2 * M_pad * H_pad * H_pad,
        transcendentals=0,
        bytes_accessed=(M_pad * H_pad * itemsize * n_steps          # x re-read per j
                        + H_pad * H_pad * w.dtype.itemsize * m_steps  # W re-read per i
                        + H_pad * 4 * m_steps                        # bias
                        + M_pad * H_pad * itemsize))                 # output

    out = pl.pallas_call(
        partial(_linear_residual_kernel, weighting_type=weighting_type),
        out_shape=jax.ShapeDtypeStruct((M_pad, H_pad), x.dtype),
        grid_spec=pltpu.PrefetchScalarGridSpec(
            num_scalar_prefetch=0,
            grid=grid,
            in_specs=[
                pl.BlockSpec(memory_space=pltpu.MemorySpace.SMEM),   # scale scalar
                pl.BlockSpec((tm, tk), lambda i, j, k: (i, k)),      # x (matmul LHS)
                pl.BlockSpec((tk, tn), lambda i, j, k: (k, j)),      # W^T
                pl.BlockSpec((1, tn),  lambda i, j, k: (0, j)),      # bias (f32)
            ],
            out_specs=pl.BlockSpec((tm, tn), lambda i, j, k: (i, j)),
            scratch_shapes=[pltpu.VMEM((tm, tn), jnp.float32),       # f32 accumulator
                            pltpu.VMEM((tm, tn), x.dtype)],          # residual stash
        ),
        compiler_params=pltpu.CompilerParams(
            dimension_semantics=("parallel", "parallel", "arbitrary"),
            vmem_limit_bytes=vmem_limit_bytes),
        cost_estimate=cost,
    )(scale_arr, x_p, w_p, b_eff)

    if M_pad != M or H_pad != H:
        out = out[:M, :H]
    return out.reshape(B, S, H)


if __name__ == "__main__":
    key = jax.random.PRNGKey(0)
    kx, kw, kb = jax.random.split(key, 3)

    batch, seq, hidden = 2, 8, 32
    x = jax.random.normal(kx, (batch, seq, hidden), dtype=jnp.float32)
    # deterministic synthetic parameters (nn.Linear(hidden, hidden))
    w = jax.random.normal(kw, (hidden, hidden), dtype=jnp.float32) * (1.0 / hidden ** 0.5)
    b = jax.random.normal(kb, (hidden,), dtype=jnp.float32) * 0.01
    scale = 0.5  # Scale(weight=0.5); learnable_weight just makes it a Parameter

    # float32 correctness check for both weighting types
    for wtype in ('residual', 'shortcut'):
        out = linear_residual(x, w, b, scale, weighting_type=wtype)
        out = jax.block_until_ready(out)

        lin = jnp.einsum('bsh,oh->bso', x, w) + b
        ref = scale * lin + x if wtype == 'residual' else lin + scale * x
        assert out.shape == (batch, seq, hidden)
        assert jnp.allclose(out, ref, atol=1e-5, rtol=1e-5), f"mismatch for {wtype}"

    # bf16 path: operands fed natively to the MXU with f32 accumulation
    xb, wb, bb = x.astype(jnp.bfloat16), w.astype(jnp.bfloat16), b.astype(jnp.bfloat16)
    out_bf16 = jax.block_until_ready(
        linear_residual(xb, wb, bb, scale, weighting_type='residual'))
    lin_bf16 = jnp.einsum('bsh,oh->bso', xb.astype(jnp.float32),
                          wb.astype(jnp.float32)) + bb.astype(jnp.float32)
    ref_bf16 = scale * lin_bf16 + xb.astype(jnp.float32)
    assert out_bf16.dtype == jnp.bfloat16
    assert jnp.allclose(out_bf16.astype(jnp.float32), ref_bf16, atol=1e-1, rtol=1e-1)

    print("KERNEL_OK")
</pallas_src>

<mosaic_0001>
module attributes {stable_mosaic.version = 11 : i64} {
  func.func @_linear_residual_kernel(%arg0: i32, %arg1: i32, %arg2: i32, %arg3: memref<1xf32, #tpu.memory_space<smem>>, %arg4: memref<16x128xf32, #tpu.memory_space<vmem>>, %arg5: memref<128x128xf32, #tpu.memory_space<vmem>>, %arg6: memref<1x128xf32, #tpu.memory_space<vmem>>, %arg7: memref<16x128xf32, #tpu.memory_space<vmem>>, %arg8: memref<16x128xf32, #tpu.memory_space<vmem>>, %arg9: memref<16x128xf32, #tpu.memory_space<vmem>>) attributes {dimension_semantics = [#tpu.dimension_semantics<parallel>, #tpu.dimension_semantics<parallel>, #tpu.dimension_semantics<arbitrary>], iteration_bounds = array<i64: 1, 1, 1>, scalar_prefetch = 0 : i64, scratch_operands = 2 : i64, tpu.core_type = #tpu.core_type<tc>, window_params = [{transform_indices = @transform_0, window_bounds = array<i64: 1>}, {transform_indices = @transform_1, window_bounds = array<i64: 16, 128>}, {transform_indices = @transform_2, window_bounds = array<i64: 128, 128>}, {transform_indices = @transform_3, window_bounds = array<i64: 1, 128>}, {transform_indices = @transform_4, window_bounds = array<i64: 16, 128>}]} {
    %c0_i32 = arith.constant 0 : i32
    %0 = arith.cmpi eq, %arg2, %c0_i32 : i32
    %1 = arith.extui %0 : i1 to i32
    %c0_i32_0 = arith.constant 0 : i32
    %2 = arith.cmpi ne, %1, %c0_i32_0 : i32
    scf.if %2 {
      %cst_11 = arith.constant 0.000000e+00 : f32
      %15 = vector.broadcast %cst_11 : f32 to vector<16x128xf32>
      %c0_12 = arith.constant 0 : index
      %c0_13 = arith.constant 0 : index
      %16 = vector.load %arg8[%c0_12, %c0_13] : memref<16x128xf32, #tpu.memory_space<vmem>>, vector<16x128xf32>
      tpu.vector_store %arg8[%c0_12, %c0_13], %15 {strides = array<i32>} : memref<16x128xf32, #tpu.memory_space<vmem>>, vector<16x128xf32>,
    } else {
    }
    %3 = arith.cmpi eq, %arg2, %arg1 : i32
    %4 = arith.extui %3 : i1 to i32
    %c0_i32_1 = arith.constant 0 : i32
    %5 = arith.cmpi ne, %4, %c0_i32_1 : i32
    scf.if %5 {
      %c0_11 = arith.constant 0 : index
      %c0_12 = arith.constant 0 : index
      %15 = vector.load %arg4[%c0_11, %c0_12] : memref<16x128xf32, #tpu.memory_space<vmem>>, vector<16x128xf32>
      %c0_13 = arith.constant 0 : index
      %c0_14 = arith.constant 0 : index
      %16 = vector.load %arg9[%c0_13, %c0_14] : memref<16x128xf32, #tpu.memory_space<vmem>>, vector<16x128xf32>
      tpu.vector_store %arg9[%c0_13, %c0_14], %15 {strides = array<i32>} : memref<16x128xf32, #tpu.memory_space<vmem>>, vector<16x128xf32>,
    } else {
    }
    %c0 = arith.constant 0 : index
    %c0_2 = arith.constant 0 : index
    %6 = vector.load %arg8[%c0, %c0_2] : memref<16x128xf32, #tpu.memory_space<vmem>>, vector<16x128xf32>
    %c0_3 = arith.constant 0 : index
    %c0_4 = arith.constant 0 : index
    %7 = vector.load %arg4[%c0_3, %c0_4] : memref<16x128xf32, #tpu.memory_space<vmem>>, vector<16x128xf32>
    %c0_5 = arith.constant 0 : index
    %c0_6 = arith.constant 0 : index
    %8 = vector.load %arg5[%c0_5, %c0_6] : memref<128x128xf32, #tpu.memory_space<vmem>>, vector<128x128xf32>
    %cst = arith.constant dense<0.000000e+00> : vector<16x128xf32>
    %9 = tpu.matmul %7, %8, %cst {dimension_numbers = #tpu.dot_dimension_numbers<[1], [0], [0], [1], [0, 0, 1, 1], [], []>} : vector<16x128xf32>, vector<128x128xf32>, vector<16x128xf32> -> vector<16x128xf32>
    %10 = arith.addf %6, %9 : vector<16x128xf32>
    %c0_7 = arith.constant 0 : index
    %c0_8 = arith.constant 0 : index
    %11 = vector.load %arg8[%c0_7, %c0_8] : memref<16x128xf32, #tpu.memory_space<vmem>>, vector<16x128xf32>
    tpu.vector_store %arg8[%c0_7, %c0_8], %10 {strides = array<i32>} : memref<16x128xf32, #tpu.memory_space<vmem>>, vector<16x128xf32>,
    %c0_i32_9 = arith.constant 0 : i32
    %12 = arith.cmpi eq, %arg2, %c0_i32_9 : i32
    %13 = arith.extui %12 : i1 to i32
    %c0_i32_10 = arith.constant 0 : i32
    %14 = arith.cmpi ne, %13, %c0_i32_10 : i32
    scf.if %14 {
      %c0_11 = arith.constant 0 : index
      %15 = memref.load %arg3[%c0_11] : memref<1xf32, #tpu.memory_space<smem>>
      %c0_12 = arith.constant 0 : index
      %c0_13 = arith.constant 0 : index
      %16 = vector.load %arg9[%c0_12, %c0_13] : memref<16x128xf32, #tpu.memory_space<vmem>>, vector<16x128xf32>
      %c0_14 = arith.constant 0 : index
      %c0_15 = arith.constant 0 : index
      %17 = vector.load %arg6[%c0_14, %c0_15] : memref<1x128xf32, #tpu.memory_space<vmem>>, vector<1x128xf32>
      %c0_16 = arith.constant 0 : index
      %c0_17 = arith.constant 0 : index
      %18 = vector.load %arg8[%c0_16, %c0_17] : memref<16x128xf32, #tpu.memory_space<vmem>>, vector<16x128xf32>
      %19 = vector.broadcast %15 : f32 to vector<16x128xf32>
      %20 = arith.mulf %19, %18 : vector<16x128xf32>
      %21 = vector.broadcast %17 : vector<1x128xf32> to vector<16x128xf32>
      %22 = arith.addf %16, %21 : vector<16x128xf32>
      %23 = arith.addf %20, %22 : vector<16x128xf32>
      %c0_18 = arith.constant 0 : index
      %c0_19 = arith.constant 0 : index
      %24 = vector.load %arg7[%c0_18, %c0_19] : memref<16x128xf32, #tpu.memory_space<vmem>>, vector<16x128xf32>
      tpu.vector_store %arg7[%c0_18, %c0_19], %23 {strides = array<i32>} : memref<16x128xf32, #tpu.memory_space<vmem>>, vector<16x128xf32>,
    } else {
    }
    return
  }
  func.func @transform_0(%arg0: i32, %arg1: i32, %arg2: i32) -> i32 {
    %c0_i32 = arith.constant 0 : i32
    %c0_i32_0 = arith.constant 0 : i32
    return %c0_i32 : i32
  }
  func.func @transform_1(%arg0: i32, %arg1: i32, %arg2: i32) -> (i32, i32) {
    %c0_i32 = arith.constant 0 : i32
    return %arg0, %arg2 : i32, i32
  }
  func.func @transform_2(%arg0: i32, %arg1: i32, %arg2: i32) -> (i32, i32) {
    %c0_i32 = arith.constant 0 : i32
    return %arg2, %arg1 : i32, i32
  }
  func.func @transform_3(%arg0: i32, %arg1: i32, %arg2: i32) -> (i32, i32) {
    %c0_i32 = arith.constant 0 : i32
    %c0_i32_0 = arith.constant 0 : i32
    return %c0_i32, %arg1 : i32, i32
  }
  func.func @transform_4(%arg0: i32, %arg1: i32, %arg2: i32) -> (i32, i32) {
    %c0_i32 = arith.constant 0 : i32
    return %arg0, %arg1 : i32, i32
  }
}

</mosaic_0001>

<bundles_post_ra>
// kernel: tpu_custom_call.1
= control target key start
LH: loop header
LB: loop body
LE: loop exit
PB: predicated region body
PF: predicated region fallthrough
CT: control target
= control target key end

     0   :  { %10 = vsyncpa [#allocation6], 0  ;;  %s497_s0 = inlined_call_operand.<no memory space> [shape: f32[1], index: 0, kind: input, shape index: {}]   ;;  %s498_s1 = inlined_call_operand.hbm [shape: f32[16,128], index: 1, kind: input, shape index: {}]   ;;  %s499_s2 = inlined_call_operand.hbm [shape: f32[128,128], index: 2, kind: input, shape index: {}]   ;;  %s500_s3 = inlined_call_operand.hbm [shape: f32[1,128], index: 3, kind: input, shape index: {}]   ;;  %s501_s4 = inlined_call_operand.hbm [shape: f32[16,128], index: 4, kind: output, shape index: {}]  }
   0x1   :  { %11 = vsyncpa [#allocation9], 0 }
   0x2   :  { %12 = vsyncpa [#allocation7], 0  ;;  %s399_s15 = smov [#allocation8]   ;;  %s400_s17 = smov [#allocation5]  }
   0x3   :  { %s32_s16 = sshll.u32 %s399_s15, 4  ;;  %s20_s18 = sshll.u32 %s400_s17, 4  ;;  %s33_s16 = int_to_ptr.vmem [resolvable:$true] %s32_s16  ;;  %s430_s18 = int_to_ptr.vmem [resolvable:$true] %s20_s18 }
   0x4   :  { %s305_s21 = scalar_lea.hbm %s499_s2, 2048 }
   0x5   :  { %p306_p0 = scmp.ne.s32.totalorder %s499_s2, %s305_s21  ;;  %p309_p1 = scmp.lt.u32.totalorder %s305_s21, %s499_s2 }
   0x7   :  { %p311_p2 = pnand %p309_p1, %p306_p0 }
   0x9   :  { %314 = shalt.err (!%p311_p2)
}
   0xa   :  { %s315_s26 = scalar_lea.vmem %s33_s16, 2048  ;;  %p320_p4 = scmp.lt.s32.totalorder %s33_s16, %s33_s16 }
   0xb   :  { %p316_p3 = scmp.ne.s32.totalorder %s33_s16, %s315_s26  ;;  %p321_p5 = scmp.lt.s32.totalorder %s315_s26, %s315_s26 }
   0xd   :  { %p322_p6 = por %p321_p5, %p320_p4 }
   0xf   :  { %p323_p7 = pnand %p322_p6, %p316_p3 }
  0x11   :  { %326 = shalt.err (!%p323_p7)
}
  0x12   :  { %s401_s27 = smov 128   ;;  %s402_s28 = smov 8  }
  0x13   :  { %38 = dma.hbm_to_vmem [thread:$0]  %s499_s2, 2048, %s33_s16, [#allocation9], %s401_s27, %s401_s27, %s402_s28  }
  0x14   :  { %s327_s7 = scalar_lea.hbm %s498_s1, 256 }
  0x15   :  { %p328_p8 = scmp.ne.s32.totalorder %s498_s1, %s327_s7  ;;  %p331_p9 = scmp.lt.u32.totalorder %s327_s7, %s498_s1 }
  0x17   :  { %p333_p10 = pnand %p331_p9, %p328_p8 }
  0x19   :  { %336 = shalt.err (!%p333_p10)
}
  0x1a   :  { %s337_s12 = scalar_lea.vmem %s430_s18, 256  ;;  %p342_p12 = scmp.lt.s32.totalorder %s430_s18, %s430_s18 }
  0x1b   :  { %p338_p11 = scmp.ne.s32.totalorder %s430_s18, %s337_s12  ;;  %p343_p13 = scmp.lt.s32.totalorder %s337_s12, %s337_s12 }
  0x1d   :  { %p344_p0 = por %p343_p13, %p342_p12 }
  0x1f   :  { %p345_p1 = pnand %p344_p0, %p338_p11 }
  0x21   :  { %348 = shalt.err (!%p345_p1)
}
  0x22   :  { %26 = dma.hbm_to_vmem [thread:$0]  %s498_s1, 256, %s430_s18, [#allocation6], %s401_s27, %s401_s27, %s402_s28  }
  0x23   :  { %s403_s14 = smov [#allocation10]   ;;  %s349_s19 = scalar_lea.hbm %s500_s3, 16 }
  0x24   :  { %s45_s15 = sshll.u32 %s403_s14, 4  ;;  %p350_p2 = scmp.ne.s32.totalorder %s500_s3, %s349_s19  ;;  %s46_s15 = int_to_ptr.vmem [resolvable:$true] %s45_s15 }
  0x25   :  { %p353_p3 = scmp.lt.u32.totalorder %s349_s19, %s500_s3 }
  0x27   :  { %p355_p4 = pnand %p353_p3, %p350_p2 }
  0x29   :  { %358 = shalt.err (!%p355_p4)
}
  0x2a   :  { %s359_s24 = scalar_lea.vmem %s46_s15, 16  ;;  %s363_s1 = scalar_lea.vmem %s46_s15, 32 }
  0x2b   :  { %p360_p5 = scmp.ne.s32.totalorder %s46_s15, %s359_s24  ;;  %p364_p6 = scmp.lt.s32.totalorder %s46_s15, %s46_s15 }
  0x2c   :  { %p365_p7 = scmp.lt.s32.totalorder %s363_s1, %s359_s24 }
  0x2e   :  { %p366_p8 = por %p365_p7, %p364_p6 }
  0x30   :  { %p367_p9 = pnand %p366_p8, %p360_p5 }
  0x32   :  { %370 = shalt.err (!%p367_p9)
}
  0x33   :  { %48 = dma.hbm_to_vmem [thread:$0]  %s500_s3, 16, %s46_s15, [#allocation9]  }
  0x34   :  { %393 = dma.done.wait [#allocation6], 256  }
  0x35   :  { %394 = vsyncadd [#allocation6], 4294967040 }
  0x36   :  { %395 = dma.done.wait [#allocation9], 2064  }
  0x37   :  { %396 = vsyncadd [#allocation9], 4294965232  ;;  %v76_v0 = vld [vmem:[#allocation8] sm:$0xff]  ;;  %v77_v1 = vld [vmem:[#allocation8 + $0x8] sm:$0xff]  ;;  %v180_v27 = vstv %s497_s0  ;;  %s404_s29 = smov [#allocation11]  }
  0x38   :  { %v78_v2 = vld [vmem:[#allocation8 + $0x10] sm:$0xff]  ;;  %v267_v3 = vpack.c.bf16 %v77_v1, %v76_v0  ;;  %v79_v4 = vld [vmem:[#allocation8 + $0x18] sm:$0xff]  ;;  %v80_v6 = vld [vmem:[#allocation8 + $0x20] sm:$0xff]  ;;  %s200_s30 = sshll.u32 %s404_s29, 4  ;;  %s201_s30 = int_to_ptr.vmem [resolvable:$true] %s200_s30 }
  0x39   :  { %v271_v5 = vpack.c.bf16 %v79_v4, %v78_v2  ;;  %v81_v7 = vld [vmem:[#allocation8 + $0x28] sm:$0xff]  ;;  %v74_v9 = vld [vmem:[#allocation5] sm:$0xff]  ;;  %v83_v11 = vld [vmem:[#allocation8 + $0x38] sm:$0xff]  ;;  %s371_s5 = scalar_lea.vmem %s201_s30, 256  ;;  %p376_p11 = scmp.lt.s32.totalorder %s201_s30, %s201_s30 }
  0x3a   :  { %268 = vmatprep.subr.bf16.mxu0 %v267_v3  ;;  %v275_v8 = vpack.c.bf16 %v81_v7, %v80_v6  ;;  %v82_v10 = vld [vmem:[#allocation8 + $0x30] sm:$0xff]  ;;  %264 = vmatprep.mubr.f32.mxu0 %v74_v9  ;;  %v84_v13 = vld [vmem:[#allocation8 + $0x40] sm:$0xff]  ;;  %v85_v14 = vld [vmem:[#allocation8 + $0x48] sm:$0xff]  ;;  %p372_p10 = scmp.ne.s32.totalorder %s201_s30, %s371_s5  ;;  %p377_p12 = scmp.lt.s32.totalorder %s371_s5, %s371_s5 }
  0x3b   :  { %270 = vmatpush3.bf16.msra.mxu0 %v267_v3  ;;  %v279_v12 = vpack.c.bf16 %v83_v11, %v82_v10  ;;  %v283_v15 = vpack.c.bf16 %v85_v14, %v84_v13  ;;  %v86_v16 = vld [vmem:[#allocation8 + $0x50] sm:$0xff]  ;;  %v87_v17 = vld [vmem:[#allocation8 + $0x58] sm:$0xff]  ;;  %v88_v19 = vld [vmem:[#allocation8 + $0x60] sm:$0xff] }
  0x3c   :  { %272 = vmatprep.subr.bf16.mxu0 %v271_v5  ;;  %v287_v18 = vpack.c.bf16 %v87_v17, %v86_v16  ;;  %v89_v20 = vld [vmem:[#allocation8 + $0x68] sm:$0xff]  ;;  %v90_v22 = vld [vmem:[#allocation8 + $0x70] sm:$0xff]  ;;  %v91_v23 = vld [vmem:[#allocation8 + $0x78] sm:$0xff]  ;;  %p378_p13 = por %p377_p12, %p376_p11 }
  0x3d   :  { %v291_v21 = vpack.c.bf16 %v89_v20, %v88_v19  ;;  %v295_v24 = vpack.c.bf16 %v91_v23, %v90_v22  ;;  %v75_v25 = vld [vmem:[#allocation5 + $0x8] sm:$0xff]  ;;  %v213_v26 = vld [vmem:[#allocation10] ss:$0 sm:$0xff] }
  0x3e   :  { %v190_v28 = vadd.f32 %v213_v26, %v75_v25  ;;  %v189_v30 = vadd.f32 %v213_v26, %v74_v9  ;;  %p379_p0 = pnand %p378_p13, %p372_p10 }
  0x3f   :  { %274 = vmatpush3.bf16.msra.mxu0 %v271_v5 }
  0x40   :  { %276 = vmatprep.subr.bf16.mxu0 %v275_v8 }
  0x43   :  { %278 = vmatpush3.bf16.msra.mxu0 %v275_v8 }
  0x44   :  { %280 = vmatprep.subr.bf16.mxu0 %v279_v12 }
  0x47   :  { %282 = vmatpush3.bf16.msra.mxu0 %v279_v12 }
  0x48   :  { %284 = vmatprep.subr.bf16.mxu0 %v283_v15 }
  0x4b   :  { %286 = vmatpush3.bf16.msra.mxu0 %v283_v15 }
  0x4c   :  { %288 = vmatprep.subr.bf16.mxu0 %v287_v18 }
  0x4f   :  { %290 = vmatpush3.bf16.msra.mxu0 %v287_v18 }
  0x50   :  { %292 = vmatprep.subr.bf16.mxu0 %v291_v21 }
  0x53   :  { %294 = vmatpush3.bf16.msra.mxu0 %v291_v21 }
  0x54   :  { %296 = vmatprep.subr.bf16.mxu0 %v295_v24 }
  0x57   :  { %298 = vmatpush3.bf16.msra.mxu0 %v295_v24 }
  0x5a   :  { %265 = vmatmul.mubr.f32.vlgmr.msra.gmra.mrb[0].mxu0 %v75_v25 }
 0x12d   :  { %v266_v29 = vpop.f32.mrb[0].mxu0 }
 0x12e   :  { %v182_v31 = vmul.f32 %v266_v29, %v180_v27  ;;  %v158_v32 = vpop.f32.mrb[1].mxu0 }
 0x12f   :  { %v181_v33 = vmul.f32 %v180_v27, %v158_v32 }
 0x130   :  { %v192_v34 = vadd.f32 %v190_v28, %v182_v31 }
 0x131   :  { %v191_v35 = vadd.f32 %v189_v30, %v181_v33 }
 0x132   :  { %194 = vst [vmem:[#allocation11 + $0x8] sm:$0xff] %v192_v34 }
 0x133   :  { %193 = vst [vmem:[#allocation11] sm:$0xff] %v191_v35 }
 0x134   :  { %382 = shalt.err (!%p379_p0)
}
 0x135   :  { %s383_s7 = scalar_lea.hbm %s501_s4, 256 }
 0x136   :  { %p384_p1 = scmp.ne.s32.totalorder %s501_s4, %s383_s7  ;;  %p387_p2 = scmp.lt.u32.totalorder %s383_s7, %s501_s4 }
 0x138   :  { %p389_p3 = pnand %p387_p2, %p384_p1 }
 0x13a   :  { %392 = shalt.err (!%p389_p3)
}
 0x13b   :  { %206 = dma.vmem_to_hbm [thread:$0]  %s201_s30, 256, %s501_s4, [#allocation7], %s401_s27, %s401_s27, %s402_s28  }
 0x13c   :  { %397 = dma.done.wait [#allocation7], 256  }
 0x13d   :  { %398 = vsyncadd [#allocation7], 4294967040 }
 0x13e   :  { %210 = vsyncpa [#allocation6], 1 }
 0x13f   :  { %211 = vsyncpa [#allocation9], 1 }
 0x140   :  { %212 = vsyncpa [#allocation7], 1 }

</bundles_post_ra>
